<compile_context>
chip_gen: v7x
topology: tpu7x:2x2x1
jax: 0.10.0
libtpu: 0.0.40
codegen_flags: <defaults>
</compile_context>

<pallas_src>
import jax
import jax.numpy as jnp
import numpy as np
from jax.experimental import pallas as pl
from jax.experimental.pallas import tpu as pltpu


def _round_up(x, m):
    return ((x + m - 1) // m) * m


def _cdiv(a, b):
    return -(-a // b)


def upsample_conv_layer_forward(x, weight, bias, *, stride, padding=1, tile_r=2048):
    """ConvTranspose2d forward (NCHW in, NCHW out) as a tiled Pallas TPU kernel.

    x:      (N, Cin, H, W)    float32
    weight: (Cin, Cout, K, K) float32   -- PyTorch ConvTranspose2d weight layout
    bias:   (Cout,)           float32
    """
    N, Cin, H, W = x.shape
    Cin_w, Cout, K, K2 = weight.shape
    assert Cin_w == Cin and K2 == K
    s = int(stride)
    p = int(padding)

    H_out = (H - 1) * s - 2 * p + K
    W_out = (W - 1) * s - 2 * p + K
    assert H_out > 0 and W_out > 0

    # ---- sub-pixel (phase) decomposition -------------------------------------------------
    # y[n,co,s*my+ry,s*mx+rx] = sum_{ci,jy,jx} x_pad[n,ci,my+jy,mx+jx] * V[ry,rx,co,ci,jy,jx]
    # where V are the per-phase filters laid on a shared (J+d_max)^2 tap superset.
    J = _cdiv(K, s)                          # real taps per axis per phase
    d_of = [(r + p) // s for r in range(s)]  # per output-residue input-row offset
    q_of = [(r + p) % s for r in range(s)]   # per output-residue weight phase
    d_max = max(d_of)
    T_ax = J + d_max                         # superset taps per axis
    T_sup = T_ax * T_ax

    M_h = _cdiv(H_out, s)                    # per-phase output rows
    M_w = _cdiv(W_out, s)                    # per-phase output cols

    # Channel padding: bf16 packs 16 sublanes/vreg (feedback), f32 packs 8.
    Cin_p = _round_up(Cin, 16)
    Cout_p = _round_up(Cout, 8)
    G = s * s * Cout_p                       # stacked output rows (all phases x Cout)

    # ---- padded input, built directly in bf16 (no stride-dilation, no extra f32 pass) ----
    lo = J - 1
    hi_h = M_h + d_max - H
    hi_w = M_w + d_max - W
    assert hi_h >= 0 and hi_w >= 0, "unsupported padding for this decomposition"
    Hp = lo + H + hi_h
    Wp = lo + W + hi_w
    x_pad = jnp.zeros((N, Cin_p, Hp, Wp), jnp.bfloat16)
    x_pad = x_pad.at[:, :Cin, lo:lo + H, lo:lo + W].set(x.astype(jnp.bfloat16))
    x_flat = x_pad.reshape(N, Cin_p, Hp * Wp)

    # ---- per-phase filters on the shared tap superset ------------------------------------
    V = jnp.zeros((s, s, Cout, Cin, T_ax, T_ax), jnp.float32)
    for ry in range(s):
        for rx in range(s):
            for jy in range(T_ax):
                ay = jy - d_of[ry]
                if not (0 <= ay < J):
                    continue
                ky = q_of[ry] + s * (J - 1 - ay)
                if ky >= K:
                    continue
                for jx in range(T_ax):
                    ax_ = jx - d_of[rx]
                    if not (0 <= ax_ < J):
                        continue
                    kx = q_of[rx] + s * (J - 1 - ax_)
                    if kx >= K:
                        continue
                    V = V.at[ry, rx, :, :, jy, jx].set(weight[:, :, ky, kx].T)

    # Stacked weight matrix: rows = (phase, cout), cols = (tap, cin) -- matches the kernel's
    # stacked operand ordering.
    W_big = jnp.zeros((s * s, Cout_p, T_sup, Cin_p), jnp.float32)
    W_big = W_big.at[:, :Cout, :, :Cin].set(
        V.reshape(s * s, Cout, Cin, T_sup).transpose(0, 1, 3, 2))
    w_stk = W_big.reshape(G, T_sup * Cin_p).astype(jnp.bfloat16)

    b_stk = jnp.zeros((s * s, Cout_p), jnp.float32)
    b_stk = b_stk.at[:, :Cout].set(jnp.broadcast_to(bias, (s * s, Cout)))
    b_stk = b_stk.reshape(G, 1)

    # ---- spatial tiling over flattened (M_h, Wp) per-phase output rows --------------------
    L = M_h * Wp                              # flat per-phase output length (Wp-M_w cols cropped)
    tile_r = max(128, _round_up(tile_r, 128))
    TR = min(tile_r, _round_up(L, 128))       # lane-dense output tile, multiple of 128
    RB = _cdiv(L, TR)
    d_span = (T_ax - 1) * (Wp + 1)            # largest flat tap offset
    TRW = _round_up(TR + d_span, 128)         # in-kernel halo window width
    Lx = _round_up(max(Hp * Wp, (RB - 1) * TR + TRW), 128)
    if Lx > Hp * Wp:
        x_flat = jnp.pad(x_flat, ((0, 0), (0, 0), (0, Lx - Hp * Wp)))

    tap_offsets = tuple(jy * Wp + jx for jy in range(T_ax) for jx in range(T_ax))
    CH = 512 if TR >= 512 else TR             # lane chunk: keeps the f32 acc <= 16 vregs

    def kernel(x_ref, w_ref, b_ref, o_ref, xs_ref):
        i = pl.program_id(1)
        base = pl.multiple_of(i * TR, 128)
        # Haloed window for this tile, sliced from the resident padded input row.
        win = x_ref[:, pl.ds(base, TRW)]                         # (Cin_p, TRW) bf16
        # Stack all superset taps along the contraction dim (shared by all s*s phases).
        for t, off in enumerate(tap_offsets):
            xs_ref[t * Cin_p:(t + 1) * Cin_p, :] = win[:, off:off + TR]
        w = w_ref[...]
        b = b_ref[...]
        # One deep matmul per lane chunk: (G, T_sup*Cin_p) @ (T_sup*Cin_p, CH) -> f32.
        for c0 in range(0, TR, CH):
            ch = min(CH, TR - c0)
            acc = jnp.dot(w, xs_ref[:, c0:c0 + ch],
                          preferred_element_type=jnp.float32)
            o_ref[:, c0:c0 + ch] = acc + b

    flops = 2 * N * RB * G * (T_sup * Cin_p) * TR
    bytes_accessed = (x_flat.size * 2 + w_stk.size * 2 + b_stk.size * 4
                      + N * G * RB * TR * 4)

    out_flat = pl.pallas_call(
        kernel,
        out_shape=jax.ShapeDtypeStruct((N, G, RB * TR), jnp.float32),
        grid=(N, RB),
        in_specs=[
            # Whole padded per-batch input row resident in VMEM (fetched once per n,
            # auto-prefetched across n); no HBM-materialized window gather.
            pl.BlockSpec((None, Cin_p, Lx), lambda n, i: (n, 0, 0)),
            pl.BlockSpec((G, T_sup * Cin_p), lambda n, i: (0, 0)),
            pl.BlockSpec((G, 1), lambda n, i: (0, 0)),
        ],
        out_specs=pl.BlockSpec((None, G, TR), lambda n, i: (n, 0, i)),
        scratch_shapes=[pltpu.VMEM((T_sup * Cin_p, TR), jnp.bfloat16)],
        compiler_params=pltpu.CompilerParams(
            dimension_semantics=("parallel", "parallel"),
            vmem_limit_bytes=32 * 1024 * 1024,
        ),
        cost_estimate=pl.CostEstimate(flops=flops, transcendentals=0,
                                      bytes_accessed=bytes_accessed),
    )(x_flat, w_stk, b_stk)

    # Crop lane/flat padding and scratch columns, pixel-shuffle the phases back into NCHW.
    out = out_flat[:, :, :L].reshape(N, s, s, Cout_p, M_h, Wp)[:, :, :, :, :, :M_w]
    out = out.transpose(0, 3, 4, 1, 5, 2).reshape(N, Cout_p, M_h * s, M_w * s)
    return out[:, :Cout, :H_out, :W_out]


def _reference(x, weight, bias, *, stride, padding=1):
    # Independent XLA reference for ConvTranspose2d (PyTorch semantics), f32.
    K = weight.shape[2]
    w_conv = jnp.transpose(weight, (1, 0, 2, 3))[:, :, ::-1, ::-1]        # (Cout, Cin, K, K)
    out = jax.lax.conv_general_dilated(
        x, w_conv,
        window_strides=(1, 1),
        padding=[(K - 1 - padding, K - 1 - padding)] * 2,
        lhs_dilation=(stride, stride),
        rhs_dilation=(1, 1),
        dimension_numbers=("NCHW", "OIHW", "NCHW"),
        preferred_element_type=jnp.float32,
    )
    return out + bias.reshape(1, -1, 1, 1)


if __name__ == "__main__":
    key = jax.random.PRNGKey(0)
    kx_, kw_, kb_ = jax.random.split(key, 3)

    # UpsampleConvLayer(in_channels=4, out_channels=8, kernel_size=4, stride=2), padding=1
    N, Cin, Cout, H, W = 2, 4, 8, 16, 16
    K, stride = 4, 2

    x = jax.random.normal(kx_, (N, Cin, H, W), jnp.float32)
    weight = 0.1 * jax.random.normal(kw_, (Cin, Cout, K, K), jnp.float32)  # ConvTranspose2d layout
    bias = 0.1 * jax.random.normal(kb_, (Cout,), jnp.float32)

    out = jax.block_until_ready(
        upsample_conv_layer_forward(x, weight, bias, stride=stride))
    ref = jax.block_until_ready(
        _reference(x, weight, bias, stride=stride))

    H_exp = (H - 1) * stride - 2 + K
    W_exp = (W - 1) * stride - 2 + K
    assert out.shape == (N, Cout, H_exp, W_exp), out.shape
    np.testing.assert_allclose(np.asarray(out), np.asarray(ref), rtol=2e-2, atol=2e-2)
    print("KERNEL_OK")
</pallas_src>

<mosaic_0001>
module attributes {stable_mosaic.version = 11 : i64} {
  func.func @kernel(%arg0: i32, %arg1: i32, %arg2: memref<1x16x512xbf16, #tpu.memory_space<vmem>>, %arg3: memref<32x144xbf16, #tpu.memory_space<vmem>>, %arg4: memref<32x1xf32, #tpu.memory_space<vmem>>, %arg5: memref<1x32x384xf32, #tpu.memory_space<vmem>>, %arg6: memref<144x384xbf16, #tpu.memory_space<vmem>>) attributes {dimension_semantics = [#tpu.dimension_semantics<parallel>, #tpu.dimension_semantics<parallel>], iteration_bounds = array<i64: 2, 1>, scalar_prefetch = 0 : i64, scratch_operands = 1 : i64, tpu.core_type = #tpu.core_type<tc>, window_params = [{transform_indices = @transform_0, window_bounds = array<i64: 1, 16, 512>}, {pipeline_mode = #tpu.pipeline_mode<synchronous>, transform_indices = @transform_1, window_bounds = array<i64: 32, 144>}, {pipeline_mode = #tpu.pipeline_mode<synchronous>, transform_indices = @transform_2, window_bounds = array<i64: 32, 1>}, {transform_indices = @transform_3, window_bounds = array<i64: 1, 32, 384>}]} {
    %c384_i32 = arith.constant 384 : i32
    %0 = arith.muli %arg1, %c384_i32 : i32
    %1 = tpu.assume_multiple %0, 128 : i32
    %c0 = arith.constant 0 : index
    %c0_0 = arith.constant 0 : index
    %2 = arith.index_cast %1 : i32 to index
    %3 = vector.load %arg2[%c0, %c0_0, %2] : memref<1x16x512xbf16, #tpu.memory_space<vmem>>, vector<1x16x512xbf16>
    %4 = vector.shape_cast %3 : vector<1x16x512xbf16> to vector<16x512xbf16>
    %5 = vector.extract_strided_slice %4 {offsets = [0, 0], sizes = [16, 384], strides = [1, 1]} : vector<16x512xbf16> to vector<16x384xbf16>
    %c0_1 = arith.constant 0 : index
    %c0_2 = arith.constant 0 : index
    %6 = vector.load %arg6[%c0_1, %c0_2] : memref<144x384xbf16, #tpu.memory_space<vmem>>, vector<16x384xbf16>
    tpu.vector_store %arg6[%c0_1, %c0_2], %5 {strides = array<i32>} : memref<144x384xbf16, #tpu.memory_space<vmem>>, vector<16x384xbf16>,
    %7 = vector.extract_strided_slice %4 {offsets = [0, 1], sizes = [16, 384], strides = [1, 1]} : vector<16x512xbf16> to vector<16x384xbf16>
    %c16 = arith.constant 16 : index
    %c0_3 = arith.constant 0 : index
    %8 = vector.load %arg6[%c16, %c0_3] : memref<144x384xbf16, #tpu.memory_space<vmem>>, vector<16x384xbf16>
    tpu.vector_store %arg6[%c16, %c0_3], %7 {strides = array<i32>} : memref<144x384xbf16, #tpu.memory_space<vmem>>, vector<16x384xbf16>,
    %9 = vector.extract_strided_slice %4 {offsets = [0, 2], sizes = [16, 384], strides = [1, 1]} : vector<16x512xbf16> to vector<16x384xbf16>
    %c32 = arith.constant 32 : index
    %c0_4 = arith.constant 0 : index
    %10 = vector.load %arg6[%c32, %c0_4] : memref<144x384xbf16, #tpu.memory_space<vmem>>, vector<16x384xbf16>
    tpu.vector_store %arg6[%c32, %c0_4], %9 {strides = array<i32>} : memref<144x384xbf16, #tpu.memory_space<vmem>>, vector<16x384xbf16>,
    %11 = vector.extract_strided_slice %4 {offsets = [0, 18], sizes = [16, 384], strides = [1, 1]} : vector<16x512xbf16> to vector<16x384xbf16>
    %c48 = arith.constant 48 : index
    %c0_5 = arith.constant 0 : index
    %12 = vector.load %arg6[%c48, %c0_5] : memref<144x384xbf16, #tpu.memory_space<vmem>>, vector<16x384xbf16>
    tpu.vector_store %arg6[%c48, %c0_5], %11 {strides = array<i32>} : memref<144x384xbf16, #tpu.memory_space<vmem>>, vector<16x384xbf16>,
    %13 = vector.extract_strided_slice %4 {offsets = [0, 19], sizes = [16, 384], strides = [1, 1]} : vector<16x512xbf16> to vector<16x384xbf16>
    %c64 = arith.constant 64 : index
    %c0_6 = arith.constant 0 : index
    %14 = vector.load %arg6[%c64, %c0_6] : memref<144x384xbf16, #tpu.memory_space<vmem>>, vector<16x384xbf16>
    tpu.vector_store %arg6[%c64, %c0_6], %13 {strides = array<i32>} : memref<144x384xbf16, #tpu.memory_space<vmem>>, vector<16x384xbf16>,
    %15 = vector.extract_strided_slice %4 {offsets = [0, 20], sizes = [16, 384], strides = [1, 1]} : vector<16x512xbf16> to vector<16x384xbf16>
    %c80 = arith.constant 80 : index
    %c0_7 = arith.constant 0 : index
    %16 = vector.load %arg6[%c80, %c0_7] : memref<144x384xbf16, #tpu.memory_space<vmem>>, vector<16x384xbf16>
    tpu.vector_store %arg6[%c80, %c0_7], %15 {strides = array<i32>} : memref<144x384xbf16, #tpu.memory_space<vmem>>, vector<16x384xbf16>,
    %17 = vector.extract_strided_slice %4 {offsets = [0, 36], sizes = [16, 384], strides = [1, 1]} : vector<16x512xbf16> to vector<16x384xbf16>
    %c96 = arith.constant 96 : index
    %c0_8 = arith.constant 0 : index
    %18 = vector.load %arg6[%c96, %c0_8] : memref<144x384xbf16, #tpu.memory_space<vmem>>, vector<16x384xbf16>
    tpu.vector_store %arg6[%c96, %c0_8], %17 {strides = array<i32>} : memref<144x384xbf16, #tpu.memory_space<vmem>>, vector<16x384xbf16>,
    %19 = vector.extract_strided_slice %4 {offsets = [0, 37], sizes = [16, 384], strides = [1, 1]} : vector<16x512xbf16> to vector<16x384xbf16>
    %c112 = arith.constant 112 : index
    %c0_9 = arith.constant 0 : index
    %20 = vector.load %arg6[%c112, %c0_9] : memref<144x384xbf16, #tpu.memory_space<vmem>>, vector<16x384xbf16>
    tpu.vector_store %arg6[%c112, %c0_9], %19 {strides = array<i32>} : memref<144x384xbf16, #tpu.memory_space<vmem>>, vector<16x384xbf16>,
    %21 = vector.extract_strided_slice %4 {offsets = [0, 38], sizes = [16, 384], strides = [1, 1]} : vector<16x512xbf16> to vector<16x384xbf16>
    %c128 = arith.constant 128 : index
    %c0_10 = arith.constant 0 : index
    %22 = vector.load %arg6[%c128, %c0_10] : memref<144x384xbf16, #tpu.memory_space<vmem>>, vector<16x384xbf16>
    tpu.vector_store %arg6[%c128, %c0_10], %21 {strides = array<i32>} : memref<144x384xbf16, #tpu.memory_space<vmem>>, vector<16x384xbf16>,
    %c0_11 = arith.constant 0 : index
    %c0_12 = arith.constant 0 : index
    %23 = vector.load %arg3[%c0_11, %c0_12] : memref<32x144xbf16, #tpu.memory_space<vmem>>, vector<32x144xbf16>
    %c0_13 = arith.constant 0 : index
    %c0_14 = arith.constant 0 : index
    %24 = vector.load %arg4[%c0_13, %c0_14] : memref<32x1xf32, #tpu.memory_space<vmem>>, vector<32x1xf32>
    %c0_15 = arith.constant 0 : index
    %c0_16 = arith.constant 0 : index
    %25 = vector.load %arg6[%c0_15, %c0_16] : memref<144x384xbf16, #tpu.memory_space<vmem>>, vector<144x384xbf16>
    %cst = arith.constant dense<0.000000e+00> : vector<32x384xf32>
    %26 = tpu.matmul %23, %25, %cst {dimension_numbers = #tpu.dot_dimension_numbers<[1], [0], [0], [1], [0, 0, 1, 1], [], []>} : vector<32x144xbf16>, vector<144x384xbf16>, vector<32x384xf32> -> vector<32x384xf32>
    %27 = vector.broadcast %24 : vector<32x1xf32> to vector<32x384xf32>
    %28 = arith.addf %26, %27 : vector<32x384xf32>
    %c0_17 = arith.constant 0 : index
    %c0_18 = arith.constant 0 : index
    %c0_19 = arith.constant 0 : index
    %29 = vector.load %arg5[%c0_17, %c0_18, %c0_19] : memref<1x32x384xf32, #tpu.memory_space<vmem>>, vector<1x32x384xf32>
    %30 = vector.shape_cast %29 : vector<1x32x384xf32> to vector<32x384xf32>
    %31 = vector.shape_cast %28 : vector<32x384xf32> to vector<1x32x384xf32>
    tpu.vector_store %arg5[%c0_17, %c0_18, %c0_19], %31 {strides = array<i32>} : memref<1x32x384xf32, #tpu.memory_space<vmem>>, vector<1x32x384xf32>,
    return
  }
  func.func @transform_0(%arg0: i32, %arg1: i32) -> (i32, i32, i32) {
    %c0_i32 = arith.constant 0 : i32
    %c0_i32_0 = arith.constant 0 : i32
    %c0_i32_1 = arith.constant 0 : i32
    return %arg0, %c0_i32, %c0_i32_0 : i32, i32, i32
  }
  func.func @transform_1(%arg0: i32, %arg1: i32) -> (i32, i32) {
    %c0_i32 = arith.constant 0 : i32
    %c0_i32_0 = arith.constant 0 : i32
    %c0_i32_1 = arith.constant 0 : i32
    return %c0_i32, %c0_i32_0 : i32, i32
  }
  func.func @transform_2(%arg0: i32, %arg1: i32) -> (i32, i32) {
    %c0_i32 = arith.constant 0 : i32
    %c0_i32_0 = arith.constant 0 : i32
    %c0_i32_1 = arith.constant 0 : i32
    return %c0_i32, %c0_i32_0 : i32, i32
  }
  func.func @transform_3(%arg0: i32, %arg1: i32) -> (i32, i32, i32) {
    %c0_i32 = arith.constant 0 : i32
    %c0_i32_0 = arith.constant 0 : i32
    return %arg0, %c0_i32, %arg1 : i32, i32, i32
  }
}

</mosaic_0001>

<bundles_post_ra>
// kernel: tpu_custom_call.1
= control target key start
LH: loop header
LB: loop body
LE: loop exit
PB: predicated region body
PF: predicated region fallthrough
CT: control target
= control target key end

     0   :  { %8 = vsyncpa [#allocation4], 0  ;;  %s1171_s0 = inlined_call_operand.hbm [shape: bf16[2,16,512], index: 0, kind: input, shape index: {}]   ;;  %s1172_s1 = inlined_call_operand.vmem [shape: bf16[32,144], index: 1, kind: input, shape index: {}]   ;;  %s1173_s2 = inlined_call_operand.vmem [shape: f32[32,1], index: 2, kind: input, shape index: {}]   ;;  %s1174_s3 = inlined_call_operand.hbm [shape: f32[2,32,384], index: 3, kind: output, shape index: {}]  }
   0x1   :  { %10 = vsyncpa [#allocation4 + $0x1], 0 }
   0x2   :  { %11 = vsyncpa [#allocation5], 0 }
   0x3   :  { %13 = vsyncpa [#allocation5 + $0x1], 0  ;;  %s941_s12 = smov 0   ;;  %s943_s13 = smov 0  }
   0x4   :  { %s945_s14 = smov 0   ;;  %s947_s15 = smov 0  }
   0x5   :  { %s949_s16 = smov 0   ;;  %s951_s17 = smov 0  }
   0x6 LB: > { %s676_s18 = sadd.s32 4294967295, %s904_s17   ;;  %s677_s19 = sadd.s32 4294967294, %s904_s17   ;;  %s904_s17 = sphi %s951_s17, %s19_s17   ;;  %s900_s16 = sphi %s949_s16, %s1189_s16   ;;  %s896_s15 = sphi %s947_s15, %s1188_s15   ;;  %s892_s14 = sphi %s945_s14, %s1187_s14   ;;  %s888_s13 = sphi %s943_s13, %s1186_s13   ;;  %s884_s12 = sphi %s941_s12, %s1185_s12  }
   0x7   : > { %s31_s20 = sadd.s32 1, %s900_s16  ;;  %s38_s21 = sadd.s32 1, %s892_s14 }
   0x8   : > { %p33_p0 = scmp.ge.s32.totalorder %s31_s20, 2  ;;  %p45_p1 = scmp.ne.s32.totalorder %s892_s14, %s888_s13 }
   0x9   : > { %p46_p2 = scmp.eq.s32.totalorder %s904_s17, 0  ;;  %p51_p3 = scmp.ne.s32.totalorder %s888_s13, %s884_s12 }
   0xa   : > { %s1191_s20 = smov (%p33_p0, %s31_s20), 0  ;;  %p52_p5 = scmp.eq.s32.totalorder %s676_s18, 0 }
   0xb   : > { %p982_p4 = por %p46_p2, %p45_p1  ;;  %s35_s23 = ssub.s32 %s900_s16, %s1191_s20 }
   0xc   : > { %p119_p6 = scmp.eq.s32.totalorder %s676_s18, 1  ;;  %p36_p7 = scmp.eq.s32.totalorder %s35_s23, 0 }
   0xd   : > { %p988_p8 = por %p52_p5, %p51_p3  ;;  %p125_p10 = scmp.eq.s32.totalorder %s677_s19, 1 }
   0xe   : > { %p992_p9 = por %p119_p6, %p45_p1  ;;  %p715_p13 = scmp.lt.s32.totalorder %s904_s17, 2 }
   0xf   : > { %s997_s26 = scalar_select %p36_p7, %s892_s14, %s38_s21  }
  0x10   : > { %s1178_s25 = scalar_select %p992_p9, 1, 0 }
  0x11   : > { %p999_p11 = por %p125_p10, %p51_p3  ;;  %s151_s28 = sand.u32 1, %s892_s14  }
  0x12   : > { %s680_s29 = sshll.u32 %s151_s28, 5  ;;  %s700_s30 = sshll.u32 %s900_s16, 9 }
  0x13   : > { %s1179_s27 = scalar_select %p999_p11, 1, 0 }
  0x14   : > { %s1010_s6 = scalar_lea.hbm %s1171_s0, %s700_s30  ;;  %s155_s7 = scalar_lea.vmem [#allocation3], %s680_s29 }
  0x15   : > { %s162_s8 = sshll.u32 %s155_s7, 4  ;;  %p1016_p0 = pnand %p715_p13, %p982_p4  ;;  %s1012_s8 = int_to_ptr.vmem [resolvable:$true] %s162_s8 }
  0x16   : > { %s1021_s10 = scalar_lea.sflag [#allocation4], %s151_s28  ;;  %s792_s11 = scalar_lea.hbm %s1010_s6, 512 }
  0x17   : > { %p793_p2 = scmp.ne.s32.totalorder %s1010_s6, %s792_s11  ;;  %p794_p3 = pneg %p1016_p0 }
  0x18   : > { %s797_s21 = scalar_lea.hbm %s1171_s0, 1024  ;;  %p798_p4 = scmp.lt.u32.totalorder %s1010_s6, %s1171_s0 }
  0x19   : > { %p795_p5 = pnand %p794_p3, %p793_p2  ;;  %p799_p7 = scmp.lt.u32.totalorder %s797_s21, %s792_s11 }
  0x1a   : > { %p801_p13 = scmp.lt.u32.totalorder %s792_s11, %s1010_s6 }
  0x1b   : > { %p796_p6 = pneg %p795_p5  ;;  %p800_p10 = por %p799_p7, %p798_p4 }
  0x1d   : > { %p802_p12 = por %p801_p13, %p800_p10 }
  0x1f   : > { %p803_p1 = pnand %p802_p12, %p796_p6 }
  0x21   : > { %806 = shalt.err (!%p803_p1)
}
  0x22   : > { %s807_s28 = scalar_lea.vmem %s1012_s8, 512  ;;  %s906_s29 = smov [#allocation3]  }
  0x23   : > { %p808_p2 = scmp.ne.s32.totalorder %s1012_s8, %s807_s28  ;;  %s812_s30 = sshll.u32 %s906_s29, 4  ;;  %s813_s30 = int_to_ptr.vmem [resolvable:$false] %s812_s30 }
  0x24   : > { %s814_s4 = scalar_lea.vmem %s813_s30, 1024  ;;  %p815_p9 = scmp.lt.s32.totalorder %s1012_s8, %s813_s30 }
  0x25   : > { %p810_p5 = pnand %p808_p2, %p794_p3  ;;  %p816_p4 = scmp.lt.s32.totalorder %s814_s4, %s807_s28 }
  0x27   : > { %p811_p11 = pneg %p810_p5  ;;  %p817_p7 = por %p816_p4, %p815_p9 }
  0x29   : > { %p818_p10 = pnand %p817_p7, %p811_p11 }
  0x2b   : > { %821 = shalt.err (!%p818_p10)
}
  0x2c   : > { %s907_s5 = smov 256   ;;  %s908_s7 = smov 16  }
  0x2d   : > { %710 = dma.hbm_to_vmem [thread:$0]  (!%p1016_p0), %s1010_s6, 512, %s1012_s8, %s1021_s10, %s907_s5, %s907_s5, %s908_s7  }
  0x2e   : > { %p170_p12 = scmp.lt.s32.totalorder %s904_s17, 3  ;;  %p1181_p1 = scmp.ge.s32.totalorder %s904_s17, 1 }
  0x30   : > { %p171_p3 = pnand %p1181_p1, %p170_p12 }
  0x31   : > { %s1053_s11 = sand.u32 (!%p171_p3), 1, %s888_s13  }
  0x32   : > { %174 = sbr.rel (%p171_p3) target bundleno = 479 (0x1df), region = 32  ;;  %s684_s18 = sshll.u32 (!%p171_p3), %s1053_s11, 5 }
  0x33   : > { %s177_s19 = scalar_lea.sflag (!%p171_p3), [#allocation4], %s1053_s11  ;;  %s180_s21 = scalar_lea.vmem (!%p171_p3), [#allocation3], %s684_s18 }
  0x39   : > { %875 = dma.done.wait (%p988_p8), %s177_s19, 512  }
  0x3a   : > { %877 = vsyncadd (%p988_p8), %s177_s19, 4294966784  ;;  %v909_v0 = vmov 0   ;;  %v780_v1 = vld [vmem:[%s180_s21 + $0x4] ss:$16 sps:$4 sm:$0xff]   ;;  %v782_v2 = vld [vmem:[%s180_s21] ss:$16 sps:$4 sm:$0xff]  }
  0x3b   : > { %513 = vmatprep.subr.bf16.mxu1 %v909_v0  ;;  %778 = vset.pattern.permute.xlu0 %v909_v0  ;;  %s910_s6 = smov 127   ;;  %v783_v3 = vld [vmem:[%s180_s21 + $0x8] ss:$16 sps:$4 sm:$0xff]   ;;  %v785_v4 = vld [vmem:[%s180_s21 + $0xc] ss:$16 sps:$4 sm:$0xff]   ;;  %s911_s24 = smov 126  }
  0x3c   : > { %779 = vset.pattern.permute.xlu1 %v909_v0  ;;  %238 = vrot.lane.b32.xlu0 %v780_v1, %s910_s6  ;;  %s912_s8 = smov 110   ;;  %s913_s9 = smov 109   ;;  %v788_v5 = vld [vmem:[%s1172_s1 + $0x4] ss:$8 sps:$4 sm:$0xff]   ;;  %vm453_vm0 = vcmask 130048   ;;  %v387_v8 = vld [vmem:[%s1173_s2 + $0x18] sm:$0xff] }
  0x3d   : > { %460 = vmatprep.subr.bf16.mxu0 %v780_v1  ;;  %236 = vrot.lane.b32.xlu1 %v782_v2, %s910_s6  ;;  %s914_s10 = smov 108   ;;  %s915_s22 = smov 92   ;;  %v384_v6 = vld [vmem:[%s1173_s2] sm:$0xff]  ;;  %v385_v7 = vld [vmem:[%s1173_s2 + $0x8] sm:$0xff]  ;;  %v386_v9 = vld [vmem:[%s1173_s2 + $0x10] sm:$0xff]  ;;  %vm244_vm1 = vcmask 1039360  }
  0x3e   : > { %461 = vmatpush1.bf16.msra.mxu0 %v782_v2  ;;  %514 = vmatpush1.bf16.msra.mxu1 %v783_v3  ;;  %s916_s23 = smov 91   ;;  %s917_s30 = smov 90   ;;  %vm262_vm2 = vcmask 1031168   ;;  %vm280_vm3 = vcmask 900096   ;;  %vm298_vm4 = vcmask 891904   ;;  %vm316_vm5 = vcmask 883712  }
  0x3f   : > { %515 = vmatprep.subr.bf16.mxu1 %v909_v0  ;;  %693 = vmatprep.mubr.msk.bf16.mxu0 %vm453_vm0, %v788_v5  ;;  %vm334_vm6 = vcmask 752640   ;;  %vm352_vm7 = vcmask 744448   ;;  %vm370_vm8 = vcmask 736256   ;;  %s701_s29 = smul.u32 96, %s1053_s11  ;;  %s575_s19 = scalar_lea.sflag [#allocation5], %s1053_s11 }
  0x40   : > { %240 = vrot.lane.b32.xlu0 %v783_v3, %s910_s6  ;;  %695 = vmatprep.mubr.msk.bf16.mxu1 %vm453_vm0, %v788_v5  ;;  %s702_s4 = smul.u32 1536, %s896_s15  ;;  %p1182_p9 = scmp.ne.s32.totalorder %s1178_s25, 0 }
  0x41   : > { %242 = vrot.lane.b32.xlu1 %v785_v4, %s910_s6  ;;  %s918_s6 = smov [#allocation6]  }
  0x42   : > { %s1115_s18 = scalar_lea.hbm %s1174_s3, %s702_s4 }
  0x44   : > { %256 = vrot.lane.b32.xlu0 %v780_v1, %s911_s24 }
  0x45   : > { %258 = vrot.lane.b32.xlu1 %v783_v3, %s911_s24 }
  0x48   : > { %254 = vrot.lane.b32.xlu0 %v782_v2, %s911_s24 }
  0x49   : > { %260 = vrot.lane.b32.xlu1 %v785_v4, %s911_s24  ;;  %s826_s24 = sshll.u32 %s918_s6, 4  ;;  %s827_s24 = int_to_ptr.vmem [resolvable:$false] %s826_s24 }
  0x4c   : > { %274 = vrot.lane.b32.xlu0 %v780_v1, %s912_s8 }
  0x4d   : > { %276 = vrot.lane.b32.xlu1 %v783_v3, %s912_s8 }
  0x50   : > { %272 = vrot.lane.b32.xlu0 %v782_v2, %s912_s8 }
  0x51   : > { %278 = vrot.lane.b32.xlu1 %v785_v4, %s912_s8  ;;  %s828_s8 = scalar_lea.vmem %s827_s24, 3072 }
  0x54   : > { %292 = vrot.lane.b32.xlu0 %v780_v1, %s913_s9 }
  0x55   : > { %294 = vrot.lane.b32.xlu1 %v783_v3, %s913_s9 }
  0x58   : > { %290 = vrot.lane.b32.xlu0 %v782_v2, %s913_s9 }
  0x59   : > { %296 = vrot.lane.b32.xlu1 %v785_v4, %s913_s9 }
  0x5c   : > { %310 = vrot.lane.b32.xlu0 %v780_v1, %s914_s10 }
  0x5d   : > { %312 = vrot.lane.b32.xlu1 %v783_v3, %s914_s10 }
  0x60   : > { %308 = vrot.lane.b32.xlu0 %v782_v2, %s914_s10 }
  0x61   : > { %314 = vrot.lane.b32.xlu1 %v785_v4, %s914_s10 }
  0x64   : > { %328 = vrot.lane.b32.xlu0 %v780_v1, %s915_s22 }
  0x65   : > { %330 = vrot.lane.b32.xlu1 %v783_v3, %s915_s22 }
  0x68   : > { %326 = vrot.lane.b32.xlu0 %v782_v2, %s915_s22 }
  0x69   : > { %332 = vrot.lane.b32.xlu1 %v785_v4, %s915_s22 }
  0x6c   : > { %346 = vrot.lane.b32.xlu0 %v780_v1, %s916_s23 }
  0x6d   : > { %348 = vrot.lane.b32.xlu1 %v783_v3, %s916_s23 }
  0x70   : > { %344 = vrot.lane.b32.xlu0 %v782_v2, %s916_s23 }
  0x71   : > { %350 = vrot.lane.b32.xlu1 %v785_v4, %s916_s23 }
  0x74   : > { %364 = vrot.lane.b32.xlu0 %v780_v1, %s917_s30 }
  0x75   : > { %366 = vrot.lane.b32.xlu1 %v783_v3, %s917_s30 }
  0x78   : > { %362 = vrot.lane.b32.xlu0 %v782_v2, %s917_s30  ;;  %v786_v2 = vld [vmem:[%s1172_s1] ss:$8 sps:$4 sm:$0xff]  }
  0x79   : > { %368 = vrot.lane.b32.xlu1 %v785_v4, %s917_s30  ;;  %v789_v4 = vld [vmem:[%s1172_s1 + $0x14] ss:$8 sps:$4 sm:$0xff]   ;;  %s1101_s30 = scalar_lea.vmem [#allocation6], %s701_s29 }
  0x7a   : > { %s590_s5 = sshll.u32 %s1101_s30, 4  ;;  %s1117_s5 = int_to_ptr.vmem [resolvable:$true] %s590_s5 }
  0x7b   : > { %s822_s21 = scalar_lea.vmem %s1117_s5, 1536  ;;  %p829_p6 = scmp.lt.s32.totalorder %s1117_s5, %s827_s24 }
  0x7c   : > { %417 = vperm.xlu0 %778, %v384_v6   ;;  %p823_p8 = scmp.ne.s32.totalorder %s1117_s5, %s822_s21  ;;  %p830_p13 = scmp.lt.s32.totalorder %s828_s8, %s822_s21 }
  0x7d   : > { %422 = vperm.xlu1 %779, %v385_v7  }
  0x7e   : > { %p824_p11 = pnand %p823_p8, %p1182_p9  ;;  %p831_p2 = por %p830_p13, %p829_p6 }
  0x80   : > { %432 = vperm.xlu0 %778, %v387_v8   ;;  %p825_p0 = pneg %p824_p11 }
  0x81   : > { %427 = vperm.xlu1 %779, %v386_v9  }
  0x82   : > { %p832_p5 = pnand %p831_p2, %p825_p0 }
  0xae   : > { %v239_v10 = vpop.permute.xlu0 %238 }
  0xaf   : > { %v237_v11 = vpop.permute.xlu1 %236 }
  0xb0   : > { %v245_v16 = vsel %vm244_vm1, %v237_v11, %v239_v10 }
  0xb2   : > { %v241_v12 = vpop.permute.xlu0 %240 }
  0xb3   : > { %v243_v13 = vpop.permute.xlu1 %242  ;;  %v246_v14 = vsel %vm244_vm1, %v239_v10, %v241_v12 }
  0xb4   : > { %462 = vmatprep.subr.bf16.mxu0 %v246_v14  ;;  %v247_v15 = vsel %vm244_vm1, %v241_v12, %v243_v13 }
  0xb5   : > { %516 = vmatpush1.bf16.msra.mxu1 %v247_v15  ;;  %463 = vmatpush1.bf16.msra.mxu0 %v245_v16 }
  0xb6   : > { %v257_v17 = vpop.permute.xlu0 %256  ;;  %517 = vmatprep.subr.bf16.mxu1 %v909_v0 }
  0xb7   : > { %v259_v18 = vpop.permute.xlu1 %258 }
  0xb8   : > { %v264_v19 = vsel %vm262_vm2, %v257_v17, %v259_v18 }
  0xb9   : > { %464 = vmatprep.subr.bf16.mxu0 %v264_v19 }
  0xba   : > { %v255_v20 = vpop.permute.xlu0 %254 }
  0xbb   : > { %v261_v21 = vpop.permute.xlu1 %260  ;;  %v263_v22 = vsel %vm262_vm2, %v255_v20, %v257_v17 }
  0xbc   : > { %465 = vmatpush1.bf16.msra.mxu0 %v263_v22  ;;  %v265_v23 = vsel %vm262_vm2, %v259_v18, %v261_v21 }
  0xbd   : > { %518 = vmatpush1.bf16.msra.mxu1 %v265_v23 }
  0xbe   : > { %v275_v24 = vpop.permute.xlu0 %274  ;;  %519 = vmatprep.subr.bf16.mxu1 %v909_v0 }
  0xbf   : > { %v277_v25 = vpop.permute.xlu1 %276 }
  0xc0   : > { %v282_v26 = vsel %vm280_vm3, %v275_v24, %v277_v25 }
  0xc1   : > { %466 = vmatprep.subr.bf16.mxu0 %v282_v26 }
  0xc2   : > { %v273_v27 = vpop.permute.xlu0 %272 }
  0xc3   : > { %v279_v28 = vpop.permute.xlu1 %278  ;;  %v281_v29 = vsel %vm280_vm3, %v273_v27, %v275_v24 }
  0xc4   : > { %467 = vmatpush1.bf16.msra.mxu0 %v281_v29  ;;  %v283_v30 = vsel %vm280_vm3, %v277_v25, %v279_v28 }
  0xc5   : > { %520 = vmatpush1.bf16.msra.mxu1 %v283_v30 }
  0xc6   : > { %v293_v31 = vpop.permute.xlu0 %292  ;;  %521 = vmatprep.subr.bf16.mxu1 %v909_v0 }
  0xc7   : > { %v295_v32 = vpop.permute.xlu1 %294 }
  0xc8   : > { %v300_v33 = vsel %vm298_vm4, %v293_v31, %v295_v32 }
  0xc9   : > { %468 = vmatprep.subr.bf16.mxu0 %v300_v33 }
  0xca   : > { %v291_v34 = vpop.permute.xlu0 %290 }
  0xcb   : > { %v297_v35 = vpop.permute.xlu1 %296  ;;  %v299_v36 = vsel %vm298_vm4, %v291_v34, %v293_v31 }
  0xcc   : > { %469 = vmatpush1.bf16.msra.mxu0 %v299_v36  ;;  %v301_v37 = vsel %vm298_vm4, %v295_v32, %v297_v35 }
  0xcd   : > { %522 = vmatpush1.bf16.msra.mxu1 %v301_v37 }
  0xce   : > { %v311_v38 = vpop.permute.xlu0 %310  ;;  %523 = vmatprep.subr.bf16.mxu1 %v909_v0 }
  0xcf   : > { %v313_v39 = vpop.permute.xlu1 %312 }
  0xd0   : > { %v318_v40 = vsel %vm316_vm5, %v311_v38, %v313_v39 }
  0xd1   : > { %470 = vmatprep.subr.bf16.mxu0 %v318_v40 }
  0xd2   : > { %v309_v41 = vpop.permute.xlu0 %308 }
  0xd3   : > { %v315_v42 = vpop.permute.xlu1 %314  ;;  %v317_v43 = vsel %vm316_vm5, %v309_v41, %v311_v38 }
  0xd4   : > { %471 = vmatpush1.bf16.msra.mxu0 %v317_v43  ;;  %v319_v44 = vsel %vm316_vm5, %v313_v39, %v315_v42 }
  0xd5   : > { %524 = vmatpush1.bf16.msra.mxu1 %v319_v44 }
  0xd6   : > { %v329_v45 = vpop.permute.xlu0 %328  ;;  %525 = vmatprep.subr.bf16.mxu1 %v909_v0 }
  0xd7   : > { %v331_v46 = vpop.permute.xlu1 %330 }
  0xd8   : > { %v336_v47 = vsel %vm334_vm6, %v329_v45, %v331_v46 }
  0xd9   : > { %472 = vmatprep.subr.bf16.mxu0 %v336_v47 }
  0xda   : > { %v327_v48 = vpop.permute.xlu0 %326 }
  0xdb   : > { %v333_v49 = vpop.permute.xlu1 %332  ;;  %v335_v50 = vsel %vm334_vm6, %v327_v48, %v329_v45 }
  0xdc   : > { %473 = vmatpush1.bf16.msra.mxu0 %v335_v50  ;;  %v337_v51 = vsel %vm334_vm6, %v331_v46, %v333_v49 }
  0xdd   : > { %526 = vmatpush1.bf16.msra.mxu1 %v337_v51 }
  0xde   : > { %v347_v52 = vpop.permute.xlu0 %346  ;;  %527 = vmatprep.subr.bf16.mxu1 %v909_v0 }
  0xdf   : > { %v349_v53 = vpop.permute.xlu1 %348 }
  0xe0   : > { %v354_v54 = vsel %vm352_vm7, %v347_v52, %v349_v53 }
  0xe1   : > { %474 = vmatprep.subr.bf16.mxu0 %v354_v54 }
  0xe2   : > { %v345_v55 = vpop.permute.xlu0 %344 }
  0xe3   : > { %v351_v56 = vpop.permute.xlu1 %350  ;;  %v353_v57 = vsel %vm352_vm7, %v345_v55, %v347_v52 }
  0xe4   : > { %475 = vmatpush1.bf16.msra.mxu0 %v353_v57  ;;  %v355_v58 = vsel %vm352_vm7, %v349_v53, %v351_v56 }
  0xe5   : > { %528 = vmatpush1.bf16.msra.mxu1 %v355_v58 }
  0xe6   : > { %v365_v59 = vpop.permute.xlu0 %364  ;;  %529 = vmatprep.subr.bf16.mxu1 %v909_v0  ;;  %v791_v0 = vld [vmem:[%s1172_s1 + $0x10] ss:$8 sps:$4 sm:$0xff]  }
  0xe7   : > { %v367_v60 = vpop.permute.xlu1 %366 }
  0xe8   : > { %v372_v61 = vsel %vm370_vm8, %v365_v59, %v367_v60 }
  0xe9   : > { %476 = vmatprep.subr.bf16.mxu0 %v372_v61 }
  0xea   : > { %v363_v62 = vpop.permute.xlu0 %362 }
  0xeb   : > { %v369_v63 = vpop.permute.xlu1 %368  ;;  %v371_v1 = vsel %vm370_vm8, %v363_v62, %v365_v59 }
  0xec   : > { %477 = vmatpush1.bf16.msra.mxu0 %v371_v1  ;;  %v373_v3 = vsel %vm370_vm8, %v367_v60, %v369_v63 }
  0xed   : > { %530 = vmatpush1.bf16.msra.mxu1 %v373_v3 }
  0xef   : > { %493 = vmatmul.mubr.bf16.vlgmr.msra.gmra.mrb[0].mxu0 %v786_v2 }
  0xf0   : > { %546 = vmatmul.mubr.bf16.vlgmr.msra.gmra.mrb[0].mxu1 %v786_v2  ;;  %694 = vmatprep.mubr.msk.bf16.mxu0 %vm453_vm0, %v789_v4 }
  0xf1   : > { %696 = vmatprep.mubr.msk.bf16.mxu1 %vm453_vm0, %v789_v4 }
  0xf7   : > { %503 = vmatmul.mubr.bf16.gmra.mrb[4].mxu0 %v791_v0 }
  0xf8   : > { %554 = vmatmul.mubr.bf16.gmra.mrb[4].mxu1 %v791_v0 }
  0xfb   : > { %v418_v5 = vpop.permute.xlu0 %417 }
  0xfc   : > { %v423_v7 = vpop.permute.xlu1 %422 }
  0xff   : > { %v433_v22 = vpop.permute.xlu0 %432 }
 0x100   : > { %v428_v21 = vpop.permute.xlu1 %427 }
 0x1c2   : > { %v494_v6 = vpop.f32.mrb[0].mxu0 }
 0x1c3   : > { %v495_v8 = vadd.f32 %v494_v6, %v418_v5  ;;  %v547_v9 = vpop.f32.mrb[0].mxu1  ;;  %v496_v10 = vpop.f32.mrb[1].mxu0 }
 0x1c4   : > { %v548_v11 = vadd.f32 %v547_v9, %v418_v5  ;;  %v497_v12 = vadd.f32 %v496_v10, %v418_v5  ;;  %v549_v13 = vpop.f32.mrb[1].mxu1  ;;  %v498_v14 = vpop.f32.mrb[2].mxu0 }
 0x1c5   : > { %562 = vst [vmem:[%s1101_s30] sm:$0xff] %v495_v8  ;;  %v550_v15 = vpop.f32.mrb[2].mxu1  ;;  %v499_v16 = vadd.f32 %v498_v14, %v423_v7  ;;  %v500_v17 = vpop.f32.mrb[3].mxu0 }
 0x1c6   : > { %564 = vst [vmem:[%s1101_s30 + $0x10] sm:$0xff] %v548_v11  ;;  %563 = vst [vmem:[%s1101_s30 + $0x8] sm:$0xff] %v497_v12  ;;  %v551_v18 = vadd.f32 %v550_v15, %v423_v7  ;;  %v501_v19 = vadd.f32 %v500_v17, %v423_v7  ;;  %v552_v20 = vpop.f32.mrb[3].mxu1 }
 0x1c7   : > { %565 = vst [vmem:[%s1101_s30 + $0x18] sm:$0xff] %v499_v16 }
 0x1c8   : > { %567 = vst [vmem:[%s1101_s30 + $0x28] sm:$0xff] %v551_v18  ;;  %566 = vst [vmem:[%s1101_s30 + $0x20] sm:$0xff] %v501_v19 }
 0x1ca   : > { %v504_v23 = vpop.f32.mrb[4].mxu0 }
 0x1cb   : > { %v505_v24 = vadd.f32 %v504_v23, %v428_v21  ;;  %v555_v25 = vpop.f32.mrb[4].mxu1  ;;  %v506_v26 = vpop.f32.mrb[5].mxu0 }
 0x1cc   : > { %v556_v27 = vadd.f32 %v555_v25, %v428_v21  ;;  %v507_v28 = vadd.f32 %v506_v26, %v428_v21  ;;  %v557_v29 = vpop.f32.mrb[5].mxu1  ;;  %v508_v30 = vpop.f32.mrb[6].mxu0 }
 0x1cd   : > { %568 = vst [vmem:[%s1101_s30 + $0x30] sm:$0xff] %v505_v24  ;;  %v509_v31 = vadd.f32 %v508_v30, %v433_v22  ;;  %v558_v32 = vpop.f32.mrb[6].mxu1  ;;  %v510_v33 = vpop.f32.mrb[7].mxu0 }
 0x1ce   : > { %570 = vst [vmem:[%s1101_s30 + $0x40] sm:$0xff] %v556_v27  ;;  %569 = vst [vmem:[%s1101_s30 + $0x38] sm:$0xff] %v507_v28  ;;  %v559_v34 = vadd.f32 %v558_v32, %v433_v22  ;;  %v511_v35 = vadd.f32 %v510_v33, %v433_v22  ;;  %v560_v36 = vpop.f32.mrb[7].mxu1 }
 0x1cf   : > { %571 = vst [vmem:[%s1101_s30 + $0x48] sm:$0xff] %v509_v31 }
 0x1d0   : > { %573 = vst [vmem:[%s1101_s30 + $0x58] sm:$0xff] %v559_v34  ;;  %572 = vst [vmem:[%s1101_s30 + $0x50] sm:$0xff] %v511_v35 }
 0x1d1   : > { %835 = shalt.err (!%p832_p5)
}
 0x1d2   : > { %s836_s9 = scalar_lea.hbm %s1115_s18, 1536  ;;  %s840_s23 = scalar_lea.hbm %s1174_s3, 3072 }
 0x1d3   : > { %p837_p4 = scmp.ne.s32.totalorder %s1115_s18, %s836_s9  ;;  %p841_p12 = scmp.lt.u32.totalorder %s1115_s18, %s1174_s3 }
 0x1d4   : > { %p842_p1 = scmp.lt.u32.totalorder %s840_s23, %s836_s9  ;;  %p844_p8 = scmp.lt.u32.totalorder %s836_s9, %s1115_s18 }
 0x1d5   : > { %p838_p7 = pnand %p837_p4, %p1182_p9 }
 0x1d6   : > { %p843_p3 = por %p842_p1, %p841_p12 }
 0x1d7   : > { %p839_p10 = pneg %p838_p7 }
 0x1d8   : > { %p845_p11 = por %p844_p8, %p843_p3 }
 0x1da   : > { %p846_p0 = pnand %p845_p11, %p839_p10 }
 0x1dc   : > { %849 = shalt.err (!%p846_p0)
}
 0x1dd   : > { %s919_s30 = smov 384   ;;  %s920_s4 = smov 24  }
 0x1de   : > { %705 = dma.vmem_to_hbm [thread:$0]  (%p1182_p9), %s1117_s5, 1536, %s1115_s18, %s575_s19, %s919_s30, %s919_s30, %s920_s4  }
 0x1df PF: > { %s605_s15 = sand.u32 1, %s884_s12   ;;  %p1183_p6 = scmp.ne.s32.totalorder %s1179_s27, 0 }
 0x1e0   : > { %p1184_p13 = scmp.ge.s32.totalorder %s904_s17, 2  ;;  %s606_s7 = scalar_lea.sflag [#allocation5], %s605_s15 }
 0x1e2   : > { %p712_p2 = pnand %p1184_p13, %p1183_p6 }
 0x1e4   : > { %879 = dma.done.wait (!%p712_p2), %s606_s7, 1536  }
 0x1e5   : > { %881 = vsyncadd (!%p712_p2), %s606_s7, 4294965760  ;;  %s19_s17 = sadd.s32 1, %s904_s17   ;;  %s1185_s12 = smov %s888_s13 }
 0x1e6   : > { %p16_p5 = scmp.ge.s32.totalorder %s19_s17, 4   ;;  %s1186_s13 = smov %s892_s14 }
 0x1e7   : > { %s1187_s14 = smov %s997_s26  ;;  %s1188_s15 = smov %s900_s16 }
 0x1e8   : > { %s1189_s16 = smov %s1191_s20  ;;  %18 = sbr.rel (!%p16_p5) target bundleno = 6 (0x6), region = 78 }
 0x1ef   :  { %611 = vsyncpa [#allocation4], 1 }
 0x1f0   :  { %613 = vsyncpa [#allocation4 + $0x1], 1 }
 0x1f1   :  { %614 = vsyncpa [#allocation5], 1 }
 0x1f2   :  { %616 = vsyncpa [#allocation5 + $0x1], 1 }

</bundles_post_ra>
